<compile_context>
chip_gen: v6e
topology: v6e:2x2x1
jax: 0.10.0
libtpu: 0.0.40
codegen_flags: <defaults>
</compile_context>

<pallas_src>
import jax
import jax.numpy as jnp
from jax import lax
from jax.experimental import pallas as pl
from jax.experimental.pallas import tpu as pltpu


NSPLIT = 2  # leading "parallel" grid axis -> both TensorCores on v7x


def _cdiv(a, b):
    return (a + b - 1) // b


def _round_up(x, m):
    return ((x + m - 1) // m) * m


def _round_down(x, m):
    return (x // m) * m


def _make_kernel(T, L, tt, steps):
    def kernel(pred_ref, tgt_ref, ss_ref, cc_ref, acc_ref, cnt_ref):
        s = pl.program_id(0)   # parallel split (core) index
        j = pl.program_id(1)   # row-tile step within the split

        @pl.when(j == 0)
        def _():
            acc_ref[...] = jnp.zeros_like(acc_ref)
            cnt_ref[...] = jnp.zeros_like(cnt_ref)

        p = pred_ref[...].astype(jnp.float32)
        t = tgt_ref[...].astype(jnp.float32)

        # Global (unclamped) block index -> row offsets.  Masks both the ragged
        # T-tail of the last real block and any clamped duplicate blocks that a
        # split reads past the end of its range.
        blk = s * steps + j
        row = blk * tt + lax.broadcasted_iota(jnp.int32, (tt, L), 0)
        valid = jnp.logical_and(t == t, row < T)   # NaN mask & row-range mask

        d = jnp.where(valid, p - t, 0.0)
        # Steady state: elementwise (VALU) accumulation only.  Counts stay well
        # below 2^24 per column (<= T), so f32 accumulation is exact enough.
        acc_ref[...] += d * d
        cnt_ref[...] += valid.astype(jnp.float32)

        # Single finalize reduction per split (the only cross-sublane reduce).
        @pl.when(j == steps - 1)
        def _():
            ss_ref[...] = jnp.sum(acc_ref[...], axis=0,
                                  keepdims=True).reshape(1, 1, L)
            cc_ref[...] = jnp.sum(cnt_ref[...], axis=0,
                                  keepdims=True).reshape(1, 1, L)

    return kernel


@jax.jit
def mse_loss(output, target):
    """Masked per-variable MSE summed over variables, as in hydroDL MSELoss."""
    T, B, ny = target.shape
    L = B * ny

    # Free reshapes (collapse of trailing contiguous dims): no transpose,
    # no padding, no host-side dtype cast.
    p2 = output.reshape(T, L)
    t2 = target.reshape(T, L)

    # Row tile sized so one f32 input buffer is ~2 MiB of VMEM (lane-padded):
    # 2 inputs x 2 pipeline buffers + 2 accumulators ~= 12 MiB, safe on v7x's
    # smaller VMEM as well.
    lanes = _round_up(L, 128)
    tt = max(8, _round_down((2 * 1024 * 1024) // (lanes * 4), 8))
    if tt >= T:
        tt = T                         # full-extent block is always legal
    nblocks = _cdiv(T, tt)
    steps = _cdiv(nblocks, NSPLIT)

    def in_map(s, j):
        # Clamp so padded steps of an uneven split re-read the last real block
        # (their contribution is masked out in-kernel).
        return (jnp.minimum(s * steps + j, nblocks - 1), 0)

    ss, cc = pl.pallas_call(
        _make_kernel(T, L, tt, steps),
        out_shape=(jax.ShapeDtypeStruct((NSPLIT, 1, L), jnp.float32),
                   jax.ShapeDtypeStruct((NSPLIT, 1, L), jnp.float32)),
        grid_spec=pltpu.PrefetchScalarGridSpec(
            num_scalar_prefetch=0,
            grid=(NSPLIT, steps),
            in_specs=[
                pl.BlockSpec((tt, L), in_map),
                pl.BlockSpec((tt, L), in_map),
            ],
            out_specs=[
                pl.BlockSpec((1, 1, L), lambda s, j: (s, 0, 0)),
                pl.BlockSpec((1, 1, L), lambda s, j: (s, 0, 0)),
            ],
            scratch_shapes=[
                pltpu.VMEM((tt, L), jnp.float32),
                pltpu.VMEM((tt, L), jnp.float32),
            ],
        ),
        compiler_params=pltpu.CompilerParams(
            dimension_semantics=("parallel", "arbitrary"),
            vmem_limit_bytes=32 * 1024 * 1024,
        ),
    )(p2, t2)

    # Tiny epilogue in plain JAX: fold the split axis, regroup columns by
    # variable (column c = b*ny + k), and form sum_k mean_k.
    ss_k = ss.sum(axis=(0, 1)).reshape(B, ny).sum(axis=0)
    cc_k = cc.sum(axis=(0, 1)).reshape(B, ny).sum(axis=0)
    return jnp.sum(ss_k / cc_k)


def _reference(output, target):
    ny = target.shape[2]
    loss = 0.0
    for k in range(ny):
        p0 = output[:, :, k]
        t0 = target[:, :, k]
        mask = ~jnp.isnan(t0)
        diff = jnp.where(mask, p0 - t0, 0.0)
        cnt = jnp.sum(mask)
        loss = loss + jnp.sum(diff * diff) / cnt
    return loss


if __name__ == "__main__":
    key = jax.random.PRNGKey(0)
    k1, k2, k3 = jax.random.split(key, 3)

    T, B, NY = 8, 2, 4                        # seq=8, batch=2, n_vars=4
    output = jax.random.normal(k1, (T, B, NY), dtype=jnp.float32)
    target = jax.random.normal(k2, (T, B, NY), dtype=jnp.float32)

    # Sprinkle NaNs into the target to exercise the mask path.
    nan_mask = jax.random.bernoulli(k3, 0.2, (T, B, NY))
    target = jnp.where(nan_mask, jnp.nan, target)

    loss = mse_loss(output, target)
    jax.block_until_ready(loss)

    ref = _reference(output, target)
    assert jnp.allclose(loss, ref, rtol=1e-5, atol=1e-6), (loss, ref)

    print("KERNEL_OK")
</pallas_src>

<mosaic_0001>
module attributes {stable_mosaic.version = 11 : i64} {
  func.func @kernel(%arg0: i32, %arg1: i32, %arg2: memref<8x8xf32, #tpu.memory_space<vmem>>, %arg3: memref<8x8xf32, #tpu.memory_space<vmem>>, %arg4: memref<1x1x8xf32, #tpu.memory_space<vmem>>, %arg5: memref<1x1x8xf32, #tpu.memory_space<vmem>>, %arg6: memref<8x8xf32, #tpu.memory_space<vmem>>, %arg7: memref<8x8xf32, #tpu.memory_space<vmem>>) attributes {dimension_semantics = [#tpu.dimension_semantics<parallel>, #tpu.dimension_semantics<arbitrary>], iteration_bounds = array<i64: 2, 1>, scalar_prefetch = 0 : i64, scratch_operands = 2 : i64, tpu.core_type = #tpu.core_type<tc>, window_params = [{transform_indices = @transform_0, window_bounds = array<i64: 8, 8>}, {transform_indices = @transform_1, window_bounds = array<i64: 8, 8>}, {transform_indices = @transform_2, window_bounds = array<i64: 1, 1, 8>}, {transform_indices = @transform_3, window_bounds = array<i64: 1, 1, 8>}]} {
    %c0_i32 = arith.constant 0 : i32
    %0 = arith.cmpi eq, %arg1, %c0_i32 : i32
    %1 = arith.extui %0 : i1 to i32
    %c0_i32_0 = arith.constant 0 : i32
    %2 = arith.cmpi ne, %1, %c0_i32_0 : i32
    scf.if %2 {
      %cst_15 = arith.constant 0.000000e+00 : f32
      %30 = vector.broadcast %cst_15 : f32 to vector<8x8xf32>
      %c0_16 = arith.constant 0 : index
      %c0_17 = arith.constant 0 : index
      %31 = vector.load %arg6[%c0_16, %c0_17] : memref<8x8xf32, #tpu.memory_space<vmem>>, vector<8x8xf32>
      tpu.vector_store %arg6[%c0_16, %c0_17], %30 {strides = array<i32>} : memref<8x8xf32, #tpu.memory_space<vmem>>, vector<8x8xf32>,
      %cst_18 = arith.constant 0.000000e+00 : f32
      %32 = vector.broadcast %cst_18 : f32 to vector<8x8xf32>
      %c0_19 = arith.constant 0 : index
      %c0_20 = arith.constant 0 : index
      %33 = vector.load %arg7[%c0_19, %c0_20] : memref<8x8xf32, #tpu.memory_space<vmem>>, vector<8x8xf32>
      tpu.vector_store %arg7[%c0_19, %c0_20], %32 {strides = array<i32>} : memref<8x8xf32, #tpu.memory_space<vmem>>, vector<8x8xf32>,
    } else {
    }
    %c0 = arith.constant 0 : index
    %c0_1 = arith.constant 0 : index
    %3 = vector.load %arg2[%c0, %c0_1] : memref<8x8xf32, #tpu.memory_space<vmem>>, vector<8x8xf32>
    %c0_2 = arith.constant 0 : index
    %c0_3 = arith.constant 0 : index
    %4 = vector.load %arg3[%c0_2, %c0_3] : memref<8x8xf32, #tpu.memory_space<vmem>>, vector<8x8xf32>
    %c1_i32 = arith.constant 1 : i32
    %5 = arith.muli %arg0, %c1_i32 : i32
    %6 = arith.addi %5, %arg1 : i32
    %c8_i32 = arith.constant 8 : i32
    %7 = arith.muli %6, %c8_i32 : i32
    %8 = tpu.iota {dimensions = array<i32: 0>} : vector<8x8xi32>
    %9 = vector.broadcast %7 : i32 to vector<8x8xi32>
    %10 = arith.addi %9, %8 : vector<8x8xi32>
    %11 = arith.cmpf oeq, %4, %4 : vector<8x8xf32>
    %c8_i32_4 = arith.constant 8 : i32
    %12 = vector.broadcast %c8_i32_4 : i32 to vector<8x8xi32>
    %13 = arith.cmpi slt, %10, %12 : vector<8x8xi32>
    %14 = arith.andi %11, %13 : vector<8x8xi1>
    %15 = arith.subf %3, %4 : vector<8x8xf32>
    %cst = arith.constant 0.000000e+00 : f32
    %16 = vector.broadcast %cst : f32 to vector<8x8xf32>
    %17 = arith.select %14, %15, %16 : vector<8x8xi1>, vector<8x8xf32>
    %c0_5 = arith.constant 0 : index
    %c0_6 = arith.constant 0 : index
    %18 = vector.load %arg6[%c0_5, %c0_6] : memref<8x8xf32, #tpu.memory_space<vmem>>, vector<8x8xf32>
    %19 = arith.mulf %17, %17 : vector<8x8xf32>
    %20 = arith.addf %18, %19 : vector<8x8xf32>
    %c0_7 = arith.constant 0 : index
    %c0_8 = arith.constant 0 : index
    %21 = vector.load %arg6[%c0_7, %c0_8] : memref<8x8xf32, #tpu.memory_space<vmem>>, vector<8x8xf32>
    tpu.vector_store %arg6[%c0_7, %c0_8], %20 {strides = array<i32>} : memref<8x8xf32, #tpu.memory_space<vmem>>, vector<8x8xf32>,
    %c0_9 = arith.constant 0 : index
    %c0_10 = arith.constant 0 : index
    %22 = vector.load %arg7[%c0_9, %c0_10] : memref<8x8xf32, #tpu.memory_space<vmem>>, vector<8x8xf32>
    %23 = arith.extui %14 : vector<8x8xi1> to vector<8x8xi32>
    %24 = arith.sitofp %23 : vector<8x8xi32> to vector<8x8xf32>
    %25 = arith.addf %22, %24 : vector<8x8xf32>
    %c0_11 = arith.constant 0 : index
    %c0_12 = arith.constant 0 : index
    %26 = vector.load %arg7[%c0_11, %c0_12] : memref<8x8xf32, #tpu.memory_space<vmem>>, vector<8x8xf32>
    tpu.vector_store %arg7[%c0_11, %c0_12], %25 {strides = array<i32>} : memref<8x8xf32, #tpu.memory_space<vmem>>, vector<8x8xf32>,
    %c0_i32_13 = arith.constant 0 : i32
    %27 = arith.cmpi eq, %arg1, %c0_i32_13 : i32
    %28 = arith.extui %27 : i1 to i32
    %c0_i32_14 = arith.constant 0 : i32
    %29 = arith.cmpi ne, %28, %c0_i32_14 : i32
    scf.if %29 {
      %c0_15 = arith.constant 0 : index
      %c0_16 = arith.constant 0 : index
      %30 = vector.load %arg6[%c0_15, %c0_16] : memref<8x8xf32, #tpu.memory_space<vmem>>, vector<8x8xf32>
      %cst_17 = arith.constant dense<0.000000e+00> : vector<8xf32>
      %31 = vector.multi_reduction <add>, %30, %cst_17 [0] : vector<8x8xf32> to vector<8xf32>
      %32 = vector.shape_cast %31 : vector<8xf32> to vector<1x8xf32>
      %33 = vector.shape_cast %32 : vector<1x8xf32> to vector<1x1x8xf32>
      %c0_18 = arith.constant 0 : index
      %c0_19 = arith.constant 0 : index
      %c0_20 = arith.constant 0 : index
      %34 = vector.load %arg4[%c0_18, %c0_19, %c0_20] : memref<1x1x8xf32, #tpu.memory_space<vmem>>, vector<1x1x8xf32>
      tpu.vector_store %arg4[%c0_18, %c0_19, %c0_20], %33 {strides = array<i32>} : memref<1x1x8xf32, #tpu.memory_space<vmem>>, vector<1x1x8xf32>,
      %c0_21 = arith.constant 0 : index
      %c0_22 = arith.constant 0 : index
      %35 = vector.load %arg7[%c0_21, %c0_22] : memref<8x8xf32, #tpu.memory_space<vmem>>, vector<8x8xf32>
      %cst_23 = arith.constant dense<0.000000e+00> : vector<8xf32>
      %36 = vector.multi_reduction <add>, %35, %cst_23 [0] : vector<8x8xf32> to vector<8xf32>
      %37 = vector.shape_cast %36 : vector<8xf32> to vector<1x8xf32>
      %38 = vector.shape_cast %37 : vector<1x8xf32> to vector<1x1x8xf32>
      %c0_24 = arith.constant 0 : index
      %c0_25 = arith.constant 0 : index
      %c0_26 = arith.constant 0 : index
      %39 = vector.load %arg5[%c0_24, %c0_25, %c0_26] : memref<1x1x8xf32, #tpu.memory_space<vmem>>, vector<1x1x8xf32>
      tpu.vector_store %arg5[%c0_24, %c0_25, %c0_26], %38 {strides = array<i32>} : memref<1x1x8xf32, #tpu.memory_space<vmem>>, vector<1x1x8xf32>,
    } else {
    }
    return
  }
  func.func @transform_0(%arg0: i32, %arg1: i32) -> (i32, i32) {
    %c1_i32 = arith.constant 1 : i32
    %0 = arith.muli %arg0, %c1_i32 : i32
    %1 = arith.addi %0, %arg1 : i32
    %c0_i32 = arith.constant 0 : i32
    %2 = arith.minsi %1, %c0_i32 : i32
    %c0_i32_0 = arith.constant 0 : i32
    %c0_i32_1 = arith.constant 0 : i32
    return %2, %c0_i32_0 : i32, i32
  }
  func.func @transform_1(%arg0: i32, %arg1: i32) -> (i32, i32) {
    %c1_i32 = arith.constant 1 : i32
    %0 = arith.muli %arg0, %c1_i32 : i32
    %1 = arith.addi %0, %arg1 : i32
    %c0_i32 = arith.constant 0 : i32
    %2 = arith.minsi %1, %c0_i32 : i32
    %c0_i32_0 = arith.constant 0 : i32
    %c0_i32_1 = arith.constant 0 : i32
    return %2, %c0_i32_0 : i32, i32
  }
  func.func @transform_2(%arg0: i32, %arg1: i32) -> (i32, i32, i32) {
    %c0_i32 = arith.constant 0 : i32
    %c0_i32_0 = arith.constant 0 : i32
    %c0_i32_1 = arith.constant 0 : i32
    return %arg0, %c0_i32, %c0_i32_0 : i32, i32, i32
  }
  func.func @transform_3(%arg0: i32, %arg1: i32) -> (i32, i32, i32) {
    %c0_i32 = arith.constant 0 : i32
    %c0_i32_0 = arith.constant 0 : i32
    %c0_i32_1 = arith.constant 0 : i32
    return %arg0, %c0_i32, %c0_i32_0 : i32, i32, i32
  }
}

</mosaic_0001>

<bundles_post_ra>
// kernel: mse_loss.1
= control target key start
LH: loop header
LB: loop body
LE: loop exit
PB: predicated region body
PF: predicated region fallthrough
CT: control target
= control target key end

     0   :  { %s475_s12 = smov 0   ;;  %s477_s13 = smov 0   ;;  %s527_s0 = inlined_call_operand.vmem [shape: f32[8,8], index: 0, kind: input, shape index: {}]   ;;  %s528_s1 = inlined_call_operand.vmem [shape: f32[8,8], index: 1, kind: input, shape index: {}]   ;;  %s529_s2 = inlined_call_operand.vmem [shape: f32[2,1,8], index: 2, kind: output, shape index: {0}]   ;;  %s530_s3 = inlined_call_operand.vmem [shape: f32[2,1,8], index: 3, kind: output, shape index: {1}]  }
   0x1   :  { %s479_s14 = smov 0  }
   0x2 LB: > { %s26_s15 = sadd.s32 1, %s448_s13  ;;  %p392_p0 = scmp.ge.s32.totalorder %s452_s14, 1  ;;  %s452_s14 = sphi %s479_s14, %s14_s14   ;;  %s448_s13 = sphi %s477_s13, %s532_s13   ;;  %s444_s12 = sphi %s475_s12, %s531_s12  }
   0x3   : > { %p28_p1 = scmp.ge.s32.totalorder %s26_s15, 2  ;;  %p184_p2 = scmp.lt.s32.totalorder %s452_s14, 3 }
   0x5   : > { %s534_s15 = smov (%p28_p1, %s26_s15), 0  ;;  %p185_p3 = pnand %p392_p0, %p184_p2 }
   0x6   : > { %p219_p4 = scmp.lt.s32.totalorder (!%p185_p3), %s444_s12, 0  ;;  %s401_s16 = sshll.u32 (!%p185_p3), %s444_s12, 3 }
   0x7   : > { %188 = sbr.rel (%p185_p3) target bundleno = 48 (0x30), region = 28  ;;  %p238_p5 = scmp.lt.s32.totalorder (!%p185_p3), %s444_s12, 1 }
   0xc   : > { %vm248_vm0 = vcmask 64512   ;;  %v255_v0 = vlaneseq  ;;  %v454_v1 = vmov 0.0   ;;  %v257_v2 = vstv %s401_s16  ;;  %s220_s17 = scalar_select %p219_p4, %s444_s12, 0 }
   0xd   : > { %250 = vst.msk [vmem:[#allocation3] sm:$0xff] %vm248_vm0, %v454_v1  ;;  %249 = vst.msk [vmem:[#allocation2] sm:$0xff] %vm248_vm0, %v454_v1  ;;  %s538_s12 = smov (!%p238_p5, %s444_s12), 1  ;;  %vm285_vm4 = vcmask 57344  }
   0xe   : > { %v256_v3 = vshrl.u32 %v255_v0, 7  ;;  %s536_s17 = smov (!%p219_p4, %s220_s17), 0  ;;  %s243_s27 = scalar_lea.vmem %s530_s3, %s538_s12 }
   0xf   : > { %s396_s18 = sshll.u32 %s536_s17, 3  ;;  %s240_s30 = scalar_lea.vmem %s529_s2, %s538_s12 }
  0x10   : > { %v258_v4 = vadd.s32 %v257_v2, %v256_v3  ;;  %s224_s21 = scalar_lea.vmem %s527_s0, %s396_s18  ;;  %s234_s24 = scalar_lea.vmem %s528_s1, %s396_s18 }
  0x11   : > { %v251_v5 = vld [vmem:[%s224_s21] sm:$0xff] }
  0x12   : > { %vm260_vm1 = vcmp.lt.s32.totalorder %v258_v4, 8  ;;  %v252_v6 = vld [vmem:[%s234_s24] sm:$0xff] }
  0x13   : > { %vm259_vm2 = vcmp.eq.f32.partialorder %v252_v6, %v252_v6  ;;  %v262_v7 = vsub.f32 %v251_v5, %v252_v6 }
  0x14   : > { %v269_v8 = vld [vmem:[#allocation3] sm:$0xff]  ;;  %vm261_vm3 = vmand %vm259_vm2, %vm260_vm1  ;;  %v264_v11 = vld [vmem:[#allocation2] sm:$0xff] }
  0x15   : > { %v263_v9 = vsel %vm261_vm3, %v262_v7, 0.0  ;;  %v402_v10 = vsel %vm261_vm3, 1.0, %v454_v1 }
  0x16   : > { %v265_v12 = vmul.f32 %v263_v9, %v263_v9  ;;  %v272_v13 = vadd.f32 %v402_v10, %v269_v8 }
  0x18   : > { %273 = vst.msk [vmem:[#allocation3] sm:$0xff] %vm248_vm0, %v272_v13  ;;  %v266_v14 = vadd.f32 %v265_v12, %v264_v11 }
  0x1a   : > { %268 = vst.msk [vmem:[#allocation2] sm:$0xff] %vm248_vm0, %v266_v14 }
  0x1f   : > { %v287_v15 = vld [vmem:[#allocation3] sm:$0xff] }
  0x20   : > { %v288_v16 = vsel %vm248_vm0, %v287_v15, 0.0 }
  0x21   : > { %v289_v17 = vrot.slane %v288_v16, 4  ;;  %v277_v18 = vld [vmem:[#allocation2] sm:$0xff] }
  0x22   : > { %v278_v19 = vsel %vm248_vm0, %v277_v18, 0.0 }
  0x23   : > { %v290_v20 = vadd.f32 %v289_v17, %v288_v16  ;;  %v279_v21 = vrot.slane %v278_v19, 4 }
  0x25   : > { %v291_v22 = vrot.slane %v290_v20, 2  ;;  %v280_v23 = vadd.f32 %v279_v21, %v278_v19 }
  0x27   : > { %v292_v24 = vadd.f32 %v291_v22, %v290_v20  ;;  %v281_v25 = vrot.slane %v280_v23, 2 }
  0x29   : > { %v293_v26 = vrot.slane %v292_v24, 1  ;;  %v282_v27 = vadd.f32 %v281_v25, %v280_v23 }
  0x2b   : > { %v294_v28 = vadd.f32 %v293_v26, %v292_v24  ;;  %v283_v29 = vrot.slane %v282_v27, 1 }
  0x2d   : > { %295 = vst.msk [vmem:[%s243_s27] sm:$0x1] %vm285_vm4, %v294_v28  ;;  %v284_v30 = vadd.f32 %v283_v29, %v282_v27 }
  0x2f   : > { %286 = vst.msk [vmem:[%s240_s30] sm:$0x1] %vm285_vm4, %v284_v30 }
  0x30 PF: > { %s14_s14 = sadd.s32 1, %s452_s14   ;;  %s531_s12 = smov %s448_s13 }
  0x31   : > { %p11_p6 = scmp.ge.s32.totalorder %s14_s14, 4   ;;  %s532_s13 = smov %s534_s15 }
  0x33   :  { %13 = sbr.rel (!%p11_p6) target bundleno = 2 (0x2), region = 81 }

</bundles_post_ra>
